<compile_context>
chip_gen: v7x
topology: tpu7x:2x2x1
jax: 0.10.0
libtpu: 0.0.40
codegen_flags: <defaults>
</compile_context>

<pallas_src>
import functools

import jax
import jax.numpy as jnp
import numpy as np
from jax.experimental import pallas as pl
from jax.experimental.pallas import tpu as pltpu


def compute_class_balanced_weights(samples_per_cls, beta=0.9999):
    """Mirror of the torch module's __init__ (effective-number class weights)."""
    samples = np.asarray(samples_per_cls, dtype=np.float64)
    effective_num = 1.0 - np.power(beta, samples)
    weights = (1.0 - beta) / effective_num
    weights = weights / np.sum(weights) * len(samples_per_cls)
    return jnp.asarray(weights, dtype=jnp.float32)


def _cb_focal_kernel(w_ref, logits_ref, targets_ref, out_ref, *, gamma):
    x = logits_ref[...].astype(jnp.float32)
    t = targets_ref[...].astype(jnp.float32)
    w = w_ref[...]                                   # (1, Cp) f32, row-broadcast

    # Numerically stable BCE-with-logits (same form torch uses):
    #   bce = max(x, 0) - x*t + log1p(exp(-|x|))
    bce = jnp.maximum(x, 0.0) - x * t + jnp.log1p(jnp.exp(-jnp.abs(x)))
    pt = jnp.exp(-bce)
    # NOTE(v7x): exp(-bce) could be split as exp(x*t - max(x,0)) *
    # pl.reciprocal(1 + exp(-|x|), approx=True) to relieve the single EUP slot;
    # kept in the exact form here so the result matches the reference tightly.

    one_minus_pt = 1.0 - pt
    if float(gamma) == 2.0:
        focal_factor = jnp.square(one_minus_pt)      # 1 VPU mul, no pow/NaN hazard
    else:
        focal_factor = jnp.power(jnp.maximum(one_minus_pt, 0.0), gamma)

    focal = (w * focal_factor) * bce                 # (block_rows, Cp)

    # Per-block, per-class partial sums -> lane-dense (1, Cp) output row.
    out_ref[0] = jnp.sum(focal, axis=0, keepdims=True)


def _round_up(x, m):
    return ((x + m - 1) // m) * m


def class_balanced_focal_loss(logits, targets, weights, *, gamma=2.0,
                              reduction="mean", target_block_bytes=2 << 20):
    assert logits.shape == targets.shape and logits.ndim == 2
    B, C = logits.shape
    assert weights.shape == (C,)
    if reduction not in ("mean", "sum"):
        # TODO(synk): reduction='none' (per-element loss tensor) would need an
        # elementwise-output kernel; only 'mean'/'sum' are wired up here.
        raise NotImplementedError(reduction)

    itemsize = jnp.dtype(logits.dtype).itemsize
    Cp = _round_up(C, 128)

    # Row tile: multiple of 16 (bf16-friendly), ~target_block_bytes per input
    # block, never larger than the (padded) batch itself.
    block_rows = max(16, (target_block_bytes // (Cp * itemsize)) // 16 * 16)
    block_rows = min(block_rows, _round_up(B, 16))
    Bp = _round_up(B, block_rows)
    num_blocks = Bp // block_rows

    # Padding: padded class columns get weight 0.0 (exact zero contribution);
    # padded rows use logits=+40, target=1 -> bce ~ 4e-18, (1 - pt) == 0 exactly.
    logits_p = jnp.pad(logits, ((0, Bp - B), (0, Cp - C)), constant_values=40.0)
    targets_p = jnp.pad(targets, ((0, Bp - B), (0, Cp - C)), constant_values=1.0)
    w_p = jnp.pad(weights.astype(jnp.float32), (0, Cp - C)).reshape(1, Cp)

    tile_bytes = block_rows * Cp * itemsize
    # 2 inputs x 2 pipeline buffers + resident weights/output + headroom; keep
    # under 48 MiB so it is safe on v7x's 64 MiB physical VMEM, while raising
    # v5e's 16 MiB scoped default.
    vmem_limit = int(min(48 * 1024 * 1024,
                         max(32 * 1024 * 1024, 4 * tile_bytes + (8 << 20))))

    cost = pl.CostEstimate(
        flops=12 * Bp * Cp,
        transcendentals=3 * Bp * Cp,
        bytes_accessed=(logits_p.size + targets_p.size) * itemsize
        + w_p.size * 4 + num_blocks * Cp * 4,
    )

    kernel = functools.partial(_cb_focal_kernel, gamma=float(gamma))

    partials = pl.pallas_call(
        kernel,
        out_shape=jax.ShapeDtypeStruct((num_blocks, 1, Cp), jnp.float32),
        grid_spec=pltpu.PrefetchScalarGridSpec(
            num_scalar_prefetch=0,
            grid=(num_blocks,),
            in_specs=[
                pl.BlockSpec((1, Cp), lambda i: (0, 0)),           # class weights
                pl.BlockSpec((block_rows, Cp), lambda i: (i, 0)),  # logits
                pl.BlockSpec((block_rows, Cp), lambda i: (i, 0)),  # targets
            ],
            out_specs=pl.BlockSpec((1, 1, Cp), lambda i: (i, 0, 0)),
        ),
        compiler_params=pltpu.CompilerParams(
            dimension_semantics=("parallel",),
            vmem_limit_bytes=vmem_limit,
        ),
        cost_estimate=cost,
    )(w_p, logits_p, targets_p)

    total = jnp.sum(partials)
    if reduction == "mean":
        return total / jnp.float32(B * C)
    return total


def class_balanced_focal_loss_ref(logits, targets, weights, gamma=2.0):
    x = logits.astype(jnp.float32)
    t = targets.astype(jnp.float32)
    bce = jnp.maximum(x, 0.0) - x * t + jnp.log1p(jnp.exp(-jnp.abs(x)))
    pt = jnp.exp(-bce)
    loss = weights[None, :] * (1.0 - pt) ** gamma * bce
    return jnp.mean(loss)


if __name__ == "__main__":
    key = jax.random.PRNGKey(0)
    k1, k2 = jax.random.split(key)

    # Small shapes consistent with a multi-label classification head:
    # batch=16, num_classes=10 (deliberately not 128-aligned -> exercises padding).
    B, C = 16, 10
    samples_per_cls = [512, 256, 128, 64, 400, 32, 900, 700, 50, 16]
    beta, gamma = 0.9999, 2.0

    weights = compute_class_balanced_weights(samples_per_cls, beta=beta)
    logits = jax.random.normal(k1, (B, C), dtype=jnp.float32) * 2.0
    targets = (jax.random.uniform(k2, (B, C)) > 0.5).astype(jnp.float32)

    out = jax.block_until_ready(
        class_balanced_focal_loss(logits, targets, weights, gamma=gamma))
    ref = jax.block_until_ready(
        class_balanced_focal_loss_ref(logits, targets, weights, gamma=gamma))

    assert jnp.allclose(out, ref, atol=1e-6, rtol=1e-5), (out, ref)
    print("KERNEL_OK")
</pallas_src>

<mosaic_0001>
module attributes {stable_mosaic.version = 11 : i64} {
  func.func @_cb_focal_kernel(%arg0: i32, %arg1: memref<1x128xf32, #tpu.memory_space<vmem>>, %arg2: memref<16x128xf32, #tpu.memory_space<vmem>>, %arg3: memref<16x128xf32, #tpu.memory_space<vmem>>, %arg4: memref<1x1x128xf32, #tpu.memory_space<vmem>>) attributes {dimension_semantics = [#tpu.dimension_semantics<parallel>], iteration_bounds = array<i64: 1>, scalar_prefetch = 0 : i64, scratch_operands = 0 : i64, tpu.core_type = #tpu.core_type<tc>, window_params = [{pipeline_mode = #tpu.pipeline_mode<synchronous>, transform_indices = @transform_0, window_bounds = array<i64: 1, 128>}, {transform_indices = @transform_1, window_bounds = array<i64: 16, 128>}, {transform_indices = @transform_2, window_bounds = array<i64: 16, 128>}, {transform_indices = @transform_3, window_bounds = array<i64: 1, 1, 128>}]} {
    %c0 = arith.constant 0 : index
    %c0_0 = arith.constant 0 : index
    %0 = vector.load %arg2[%c0, %c0_0] : memref<16x128xf32, #tpu.memory_space<vmem>>, vector<16x128xf32>
    %c0_1 = arith.constant 0 : index
    %c0_2 = arith.constant 0 : index
    %1 = vector.load %arg3[%c0_1, %c0_2] : memref<16x128xf32, #tpu.memory_space<vmem>>, vector<16x128xf32>
    %c0_3 = arith.constant 0 : index
    %c0_4 = arith.constant 0 : index
    %2 = vector.load %arg1[%c0_3, %c0_4] : memref<1x128xf32, #tpu.memory_space<vmem>>, vector<1x128xf32>
    %cst = arith.constant 0.000000e+00 : f32
    %3 = vector.broadcast %cst : f32 to vector<16x128xf32>
    %4 = arith.maximumf %0, %3 : vector<16x128xf32>
    %5 = arith.mulf %0, %1 : vector<16x128xf32>
    %6 = arith.subf %4, %5 : vector<16x128xf32>
    %7 = math.absf %0 : vector<16x128xf32>
    %cst_5 = arith.constant 0.000000e+00 : f32
    %8 = vector.broadcast %cst_5 : f32 to vector<16x128xf32>
    %9 = arith.subf %8, %7 : vector<16x128xf32>
    %10 = math.exp %9 : vector<16x128xf32>
    %11 = math.log1p %10 : vector<16x128xf32>
    %12 = arith.addf %6, %11 : vector<16x128xf32>
    %cst_6 = arith.constant 0.000000e+00 : f32
    %13 = vector.broadcast %cst_6 : f32 to vector<16x128xf32>
    %14 = arith.subf %13, %12 : vector<16x128xf32>
    %15 = math.exp %14 : vector<16x128xf32>
    %cst_7 = arith.constant 1.000000e+00 : f32
    %16 = vector.broadcast %cst_7 : f32 to vector<16x128xf32>
    %17 = arith.subf %16, %15 : vector<16x128xf32>
    %18 = arith.mulf %17, %17 : vector<16x128xf32>
    %19 = vector.broadcast %2 : vector<1x128xf32> to vector<16x128xf32>
    %20 = arith.mulf %19, %18 : vector<16x128xf32>
    %21 = arith.mulf %20, %12 : vector<16x128xf32>
    %cst_8 = arith.constant dense<0.000000e+00> : vector<128xf32>
    %22 = vector.multi_reduction <add>, %21, %cst_8 [0] : vector<16x128xf32> to vector<128xf32>
    %23 = vector.shape_cast %22 : vector<128xf32> to vector<1x128xf32>
    %c0_9 = arith.constant 0 : index
    %c0_10 = arith.constant 0 : index
    %c0_11 = arith.constant 0 : index
    %24 = vector.load %arg4[%c0_9, %c0_10, %c0_11] : memref<1x1x128xf32, #tpu.memory_space<vmem>>, vector<1x1x128xf32>
    %25 = vector.shape_cast %24 : vector<1x1x128xf32> to vector<1x128xf32>
    %26 = vector.shape_cast %23 : vector<1x128xf32> to vector<1x1x128xf32>
    tpu.vector_store %arg4[%c0_9, %c0_10, %c0_11], %26 {strides = array<i32>} : memref<1x1x128xf32, #tpu.memory_space<vmem>>, vector<1x1x128xf32>,
    return
  }
  func.func @transform_0(%arg0: i32) -> (i32, i32) {
    %c0_i32 = arith.constant 0 : i32
    %c0_i32_0 = arith.constant 0 : i32
    %c0_i32_1 = arith.constant 0 : i32
    return %c0_i32, %c0_i32_0 : i32, i32
  }
  func.func @transform_1(%arg0: i32) -> (i32, i32) {
    %c0_i32 = arith.constant 0 : i32
    %c0_i32_0 = arith.constant 0 : i32
    return %arg0, %c0_i32 : i32, i32
  }
  func.func @transform_2(%arg0: i32) -> (i32, i32) {
    %c0_i32 = arith.constant 0 : i32
    %c0_i32_0 = arith.constant 0 : i32
    return %arg0, %c0_i32 : i32, i32
  }
  func.func @transform_3(%arg0: i32) -> (i32, i32, i32) {
    %c0_i32 = arith.constant 0 : i32
    %c0_i32_0 = arith.constant 0 : i32
    %c0_i32_1 = arith.constant 0 : i32
    return %arg0, %c0_i32, %c0_i32_0 : i32, i32, i32
  }
}

</mosaic_0001>

<bundles_post_ra>
// kernel: tpu_custom_call.1
= control target key start
LH: loop header
LB: loop body
LE: loop exit
PB: predicated region body
PF: predicated region fallthrough
CT: control target
= control target key end

     0   :  { %8 = vsyncpa [#allocation3], 0  ;;  %s330_s0 = inlined_call_operand.hbm [shape: f32[1,128], index: 0, kind: input, shape index: {}]   ;;  %s331_s1 = inlined_call_operand.hbm [shape: f32[16,128], index: 1, kind: input, shape index: {}]   ;;  %s332_s2 = inlined_call_operand.hbm [shape: f32[16,128], index: 2, kind: input, shape index: {}]   ;;  %s333_s3 = inlined_call_operand.hbm [shape: f32[1,1,128], index: 3, kind: output, shape index: {}]  }
   0x1   :  { %9 = vsyncpa [#allocation6], 0 }
   0x2   :  { %10 = vsyncpa [#allocation4], 0  ;;  %s250_s12 = smov [#allocation5]   ;;  %s156_s16 = scalar_lea.hbm %s331_s1, 256 }
   0x3   :  { %s26_s13 = sshll.u32 %s250_s12, 4  ;;  %p157_p0 = scmp.ne.s32.totalorder %s331_s1, %s156_s16  ;;  %s27_s13 = int_to_ptr.vmem [resolvable:$true] %s26_s13 }
   0x4   :  { %p160_p1 = scmp.lt.u32.totalorder %s156_s16, %s331_s1 }
   0x6   :  { %p162_p2 = pnand %p160_p1, %p157_p0 }
   0x8   :  { %165 = shalt.err (!%p162_p2)
}
   0x9   :  { %s166_s21 = scalar_lea.vmem %s27_s13, 256  ;;  %p171_p4 = scmp.lt.s32.totalorder %s27_s13, %s27_s13 }
   0xa   :  { %p167_p3 = scmp.ne.s32.totalorder %s27_s13, %s166_s21  ;;  %p172_p5 = scmp.lt.s32.totalorder %s166_s21, %s166_s21 }
   0xc   :  { %p173_p6 = por %p172_p5, %p171_p4 }
   0xe   :  { %p174_p7 = pnand %p173_p6, %p167_p3 }
  0x10   :  { %177 = shalt.err (!%p174_p7)
}
  0x11   :  { %s251_s22 = smov 128   ;;  %s252_s23 = smov 8  }
  0x12   :  { %32 = dma.hbm_to_vmem [thread:$0]  %s331_s1, 256, %s27_s13, [#allocation6], %s251_s22, %s251_s22, %s252_s23  }
  0x13   :  { %s253_s26 = smov [#allocation2]   ;;  %s254_s28 = smov [#allocation7]  }
  0x14   :  { %s17_s27 = sshll.u32 %s253_s26, 4  ;;  %s38_s29 = sshll.u32 %s254_s28, 4  ;;  %s18_s27 = int_to_ptr.vmem [resolvable:$true] %s17_s27  ;;  %s39_s29 = int_to_ptr.vmem [resolvable:$true] %s38_s29 }
  0x15   :  { %s178_s5 = scalar_lea.hbm %s330_s0, 16 }
  0x16   :  { %p179_p8 = scmp.ne.s32.totalorder %s330_s0, %s178_s5  ;;  %p182_p9 = scmp.lt.u32.totalorder %s178_s5, %s330_s0 }
  0x18   :  { %p184_p10 = pnand %p182_p9, %p179_p8 }
  0x1a   :  { %187 = shalt.err (!%p184_p10)
}
  0x1b   :  { %s188_s1 = scalar_lea.vmem %s18_s27, 16  ;;  %s192_s10 = scalar_lea.vmem %s18_s27, 32 }
  0x1c   :  { %p189_p11 = scmp.ne.s32.totalorder %s18_s27, %s188_s1  ;;  %p193_p12 = scmp.lt.s32.totalorder %s18_s27, %s18_s27 }
  0x1d   :  { %p194_p13 = scmp.lt.s32.totalorder %s192_s10, %s188_s1 }
  0x1f   :  { %p195_p0 = por %p194_p13, %p193_p12 }
  0x21   :  { %p196_p1 = pnand %p195_p0, %p189_p11 }
  0x23   :  { %199 = shalt.err (!%p196_p1)
}
  0x24   :  { %20 = dma.hbm_to_vmem [thread:$0]  %s330_s0, 16, %s18_s27, [#allocation3]  }
  0x25   :  { %s200_s15 = scalar_lea.hbm %s332_s2, 256 }
  0x26   :  { %p201_p2 = scmp.ne.s32.totalorder %s332_s2, %s200_s15  ;;  %p204_p3 = scmp.lt.u32.totalorder %s200_s15, %s332_s2 }
  0x28   :  { %p206_p4 = pnand %p204_p3, %p201_p2 }
  0x2a   :  { %209 = shalt.err (!%p206_p4)
}
  0x2b   :  { %s210_s20 = scalar_lea.vmem %s39_s29, 256  ;;  %p215_p6 = scmp.lt.s32.totalorder %s39_s29, %s39_s29 }
  0x2c   :  { %p211_p5 = scmp.ne.s32.totalorder %s39_s29, %s210_s20  ;;  %p216_p7 = scmp.lt.s32.totalorder %s210_s20, %s210_s20 }
  0x2e   :  { %p217_p8 = por %p216_p7, %p215_p6 }
  0x30   :  { %p218_p9 = pnand %p217_p8, %p211_p5 }
  0x32   :  { %221 = shalt.err (!%p218_p9)
}
  0x33   :  { %44 = dma.hbm_to_vmem [thread:$0]  %s332_s2, 256, %s39_s29, [#allocation6], %s251_s22, %s251_s22, %s252_s23  }
  0x34   :  { %244 = dma.done.wait [#allocation3], 16  }
  0x35   :  { %245 = vsyncadd [#allocation3], 4294967280 }
  0x36   :  { %246 = dma.done.wait [#allocation6], 512  }
  0x37   :  { %247 = vsyncadd [#allocation6], 4294966784  ;;  %v54_v0 = vld [vmem:[#allocation5] sm:$0xff]  ;;  %v55_v1 = vld [vmem:[#allocation5 + $0x8] sm:$0xff]  ;;  %s255_s2 = smov [#allocation8]  }
  0x38   :  { %v65_v2 = vand.u32 2147483647, %v54_v0  ;;  %v66_v3 = vand.u32 2147483647, %v55_v1  ;;  %v56_v14 = vld [vmem:[#allocation7] sm:$0xff]  ;;  %v57_v15 = vld [vmem:[#allocation7 + $0x8] sm:$0xff] }
  0x39   :  { %v59_v17 = vmax.f32 %v54_v0, 0.0  ;;  %v61_v18 = vmul.f32 %v56_v14, %v54_v0  ;;  %v60_v21 = vmax.f32 %v55_v1, 0.0  ;;  %v62_v22 = vmul.f32 %v57_v15, %v55_v1  ;;  %v137_v43 = vld [vmem:[#allocation2] ss:$0 sm:$0xff]  ;;  %s127_s22 = sshll.u32 %s255_s2, 4  ;;  %s128_s22 = int_to_ptr.vmem [resolvable:$true] %s127_s22 }
  0x3a   :  { %v67_v4 = vsub.f32 0.0, %v65_v2  ;;  %v68_v5 = vsub.f32 0.0, %v66_v3  ;;  %s222_s23 = scalar_lea.vmem %s128_s22, 16  ;;  %s226_s24 = scalar_lea.vmem %s128_s22, 32 }
  0x3b   :  { %v63_v26 = vsub.f32 %v59_v17, %v61_v18  ;;  %v64_v29 = vsub.f32 %v60_v21, %v62_v22  ;;  %p223_p10 = scmp.ne.s32.totalorder %s128_s22, %s222_s23  ;;  %p227_p11 = scmp.lt.s32.totalorder %s128_s22, %s128_s22 }
  0x3c   :  { %v69_v6 = vmul.f32 1.442695, %v67_v4  ;;  %v71_v7 = vmul.f32 1.442695, %v68_v5  ;;  %p228_p12 = scmp.lt.s32.totalorder %s226_s24, %s222_s23 }
  0x3e   :  { %144 = vpow2.f32 %v69_v6  ;;  %p229_p13 = por %p228_p12, %p227_p11 }
  0x3f   :  { %146 = vpow2.f32 %v71_v7 }
  0x40   :  { %p230_p0 = pnand %p229_p13, %p223_p10 }
  0x48   :  { %v145_v8 = vpop.eup %144 }
  0x49   :  { %v147_v9 = vpop.eup %146  ;;  %v73_v10 = vadd.f32 1.0, %v145_v8  ;;  %v76_v12 = vmul.f32 -0.5, %v145_v8  ;;  %v79_v19 = vand.u32 2147483647, %v145_v8 }
  0x4a   :  { %v82_v11 = vadd.f32 1.0, %v147_v9  ;;  %v85_v13 = vmul.f32 -0.5, %v147_v9  ;;  %v88_v23 = vand.u32 2147483647, %v147_v9 }
  0x4b   :  { %148 = vlog2.f32 %v73_v10  ;;  %v77_v16 = vadd.f32 1.0, %v76_v12  ;;  %vm80_vm0 = vcmp.lt.f32.partialorder %v79_v19, 0.0004427343 }
  0x4c   :  { %150 = vlog2.f32 %v82_v11  ;;  %v86_v20 = vadd.f32 1.0, %v85_v13  ;;  %vm89_vm1 = vcmp.lt.f32.partialorder %v88_v23, 0.0004427343 }
  0x4d   :  { %v78_v24 = vmul.f32 %v145_v8, %v77_v16 }
  0x4e   :  { %v87_v27 = vmul.f32 %v147_v9, %v86_v20 }
  0x55   :  { %v149_v25 = vpop.eup %148 }
  0x56   :  { %v151_v28 = vpop.eup %150  ;;  %v75_v30 = vmul.f32 0.6931472, %v149_v25 }
  0x57   :  { %v84_v31 = vmul.f32 0.6931472, %v151_v28 }
  0x58   :  { %v81_v32 = vsel %vm80_vm0, %v78_v24, %v75_v30 }
  0x59   :  { %v90_v33 = vsel %vm89_vm1, %v87_v27, %v84_v31  ;;  %v91_v34 = vadd.f32 %v81_v32, %v63_v26 }
  0x5a   :  { %v92_v35 = vadd.f32 %v90_v33, %v64_v29 }
  0x5b   :  { %v93_v36 = vsub.f32 0.0, %v91_v34 }
  0x5c   :  { %v94_v37 = vsub.f32 0.0, %v92_v35 }
  0x5d   :  { %v95_v38 = vmul.f32 1.442695, %v93_v36 }
  0x5e   :  { %v97_v39 = vmul.f32 1.442695, %v94_v37 }
  0x5f   :  { %152 = vpow2.f32 %v95_v38 }
  0x60   :  { %154 = vpow2.f32 %v97_v39 }
  0x69   :  { %v153_v40 = vpop.eup %152 }
  0x6a   :  { %v155_v41 = vpop.eup %154  ;;  %v99_v42 = vsub.f32 1.0, %v153_v40 }
  0x6b   :  { %v100_v44 = vsub.f32 1.0, %v155_v41 }
  0x6c   :  { %v101_v45 = vmul.f32 %v99_v42, %v99_v42 }
  0x6d   :  { %v102_v46 = vmul.f32 %v100_v44, %v100_v44 }
  0x6e   :  { %v109_v47 = vmul.f32 %v137_v43, %v101_v45 }
  0x6f   :  { %v110_v48 = vmul.f32 %v137_v43, %v102_v46 }
  0x70   :  { %v111_v49 = vmul.f32 %v109_v47, %v91_v34 }
  0x71   :  { %v112_v50 = vmul.f32 %v110_v48, %v92_v35 }
  0x73   :  { %v113_v51 = vadd.f32 %v112_v50, %v111_v49 }
  0x75   :  { %v114_v52 = vrot.slane %v113_v51, 4 }
  0x77   :  { %v115_v53 = vadd.f32 %v114_v52, %v113_v51 }
  0x79   :  { %v116_v54 = vrot.slane %v115_v53, 2 }
  0x7b   :  { %v117_v55 = vadd.f32 %v116_v54, %v115_v53 }
  0x7d   :  { %v118_v56 = vrot.slane %v117_v55, 1 }
  0x7f   :  { %v119_v57 = vadd.f32 %v118_v56, %v117_v55 }
  0x81   :  { %120 = vst [vmem:[#allocation8] sm:$0x1] %v119_v57 }
  0x82   :  { %233 = shalt.err (!%p230_p0)
}
  0x83   :  { %s234_s27 = scalar_lea.hbm %s333_s3, 16 }
  0x84   :  { %p235_p1 = scmp.ne.s32.totalorder %s333_s3, %s234_s27  ;;  %p238_p2 = scmp.lt.u32.totalorder %s234_s27, %s333_s3 }
  0x86   :  { %p240_p3 = pnand %p238_p2, %p235_p1 }
  0x88   :  { %243 = shalt.err (!%p240_p3)
}
  0x89   :  { %130 = dma.vmem_to_hbm [thread:$0]  %s128_s22, 16, %s333_s3, [#allocation4]  }
  0x8a   :  { %248 = dma.done.wait [#allocation4], 16  }
  0x8b   :  { %249 = vsyncadd [#allocation4], 4294967280 }
  0x8c   :  { %134 = vsyncpa [#allocation3], 1 }
  0x8d   :  { %135 = vsyncpa [#allocation6], 1 }
  0x8e   :  { %136 = vsyncpa [#allocation4], 1 }

</bundles_post_ra>
